<compile_context>
chip_gen: v7x
topology: tpu7x:2x2x1
jax: 0.10.0
libtpu: 0.0.40
codegen_flags: <defaults>
</compile_context>

<pallas_src>
import functools

import jax
import jax.numpy as jnp
import numpy as np
from jax.experimental import pallas as pl
from jax.experimental.pallas import tpu as pltpu


def _round_up(v, m):
    return (v + m - 1) // m * m


def _mhsa_kernel(x_ref, wqkv_ref, bqkv_ref, wo_ref, bo_ref,
                 out_ref, attn_ref, k_s, v_s, *, n, m_len, s_real, tq):
    """One (batch-tile, query-tile) step.

    x_ref:    (Bt, SK, D)   input slab (true D, SK-padded sequence)
    wqkv_ref: (D, 3*Dp)     fused QKV weight, column-padded per chunk
    bqkv_ref: (1, 3*Dp)
    wo_ref:   (Dp, D), bo_ref: (1, D)
    out_ref:  (Bt, tq, D), attn_ref: (Bt, tq, SK)
    k_s, v_s: (Bt, SK, Dp)  VMEM scratch, filled at q_tile == 0.
    """
    Bt, SK, D = x_ref.shape
    Dp = k_s.shape[-1]
    qt = pl.program_id(1)

    # ---- K/V projection once per batch-tile (grid iterates q fastest) ----
    @pl.when(qt == 0)
    def _():
        x2 = x_ref[...].reshape(Bt * SK, D)
        kv = jnp.dot(x2, wqkv_ref[:, Dp:3 * Dp],
                     preferred_element_type=jnp.float32) + bqkv_ref[:, Dp:3 * Dp]
        k_s[...] = kv[:, :Dp].reshape(Bt, SK, Dp)
        v_s[...] = kv[:, Dp:].reshape(Bt, SK, Dp)

    # ---- Q projection for this query tile only ----
    q_off = pl.multiple_of(qt * tq, tq)
    xq = x_ref[:, pl.ds(q_off, tq), :].reshape(Bt * tq, D)
    q = (jnp.dot(xq, wqkv_ref[:, 0:Dp], preferred_element_type=jnp.float32)
         + bqkv_ref[:, 0:Dp]).reshape(Bt, tq, Dp)

    # ---- scores: contraction on last dims (no k.T materialized) ----
    scores = jnp.einsum("bqd,bkd->bqk", q, k_s[...],
                        preferred_element_type=jnp.float32)        # (Bt, tq, SK)

    # ---- overlap mask generated in-kernel (VPU iota + compares); it depends
    # on the query-tile offset, so regenerating it here is cheaper than
    # streaming / caching an S^2 mask. ----
    i = jax.lax.broadcasted_iota(jnp.int32, (tq, SK), 0) + q_off
    j = jax.lax.broadcasted_iota(jnp.int32, (tq, SK), 1)
    overlap = jnp.logical_and(i * n < j * n + m_len, j * n < i * n + m_len)
    masked = jnp.logical_or(jnp.logical_or(overlap, i == j), j >= s_real)
    # -1e30 instead of -inf: exp underflows to exactly 0 for masked entries,
    # and a fully-masked row stays finite instead of producing NaN.
    scores = jnp.where(masked[None], jnp.float32(-1e30), scores)
    # (scale = head_dim ** -0.5 == 1.0 -> intentionally omitted)

    # ---- softmax over keys (exact reciprocal: approx=True breaks 1e-5) ----
    m = jnp.max(scores, axis=-1, keepdims=True)
    p = jnp.exp(scores - m)
    denom = jnp.sum(p, axis=-1, keepdims=True)
    attn = p * pl.reciprocal(denom, approx=False)
    attn_ref[...] = attn

    # ---- attend + output projection on the (Bt*tq, Dp) slab ----
    ctx = jnp.einsum("bqk,bkd->bqd", attn, v_s[...],
                     preferred_element_type=jnp.float32)           # (Bt, tq, Dp)
    out2 = jnp.dot(ctx.reshape(Bt * tq, Dp), wo_ref[...],
                   preferred_element_type=jnp.float32) + bo_ref[...]
    out_ref[...] = out2.reshape(Bt, tq, D)


def _const_spec(shape, index_map):
    """Single-buffer a grid-invariant operand (fetched once -> half the VMEM)."""
    try:
        return pl.BlockSpec(shape, index_map, pipeline_mode=pl.Buffered(1))
    except (TypeError, AttributeError):   # older jax without pipeline_mode
        return pl.BlockSpec(shape, index_map)


@functools.partial(jax.jit, static_argnames=("n", "m_len"))
def multi_head_self_attention1(x, wqkv, bqkv, wo, bo, *, n, m_len):
    """x: (B, C, H, W) NCHW.  wqkv: (3D, D), bqkv: (3D,), wo: (D, D), bo: (D,).

    Returns (output (B, S, D), attn_weights (B, 1, S, S)), num_heads == 1,
    matching MultiHeadSelfAttention1.forward."""
    B = x.shape[0]
    D = x.shape[3]                                    # seq_length == d_model
    x3 = x.reshape(B, -1, D).astype(jnp.float32)      # (B, S, D)
    S = x3.shape[1]

    # ---- padding policy ----
    # Key/query axis lane-dense (128) for the attn writeback unless S is so
    # far below the next 128 multiple that write amplification would dominate.
    sk128 = _round_up(S, 128)
    SK = sk128 if sk128 <= 2 * _round_up(S, 8) else _round_up(S, 8)
    # Internal q/k/v lane width; x / out keep the true D in HBM.
    Dp = _round_up(D, 128)

    # ---- query tile (must divide SK, multiple of 8) ----
    if SK <= 1024:
        Tq = SK
    elif SK % 512 == 0:
        Tq = 512
    elif SK % 256 == 0:
        Tq = 256
    else:
        Tq = 128

    # ---- VMEM budget from hardware (v7x: 64 MiB, v5e/v6e: 128 MiB) ----
    try:
        vmem_cap = int(pltpu.get_tpu_info().vmem_capacity_bytes)
    except Exception:
        vmem_cap = 64 * 2**20
    budget = min(int(0.8 * vmem_cap), 100 * 2**20)

    def footprint(bt, tq):
        f32 = 4
        weights = (D * 3 * Dp + 3 * Dp + Dp * D + D) * f32     # single-buffered
        xblk = 2 * bt * SK * D * f32                           # double-buffered
        scr = 2 * bt * SK * Dp * f32                           # k_s + v_s
        outblk = 2 * bt * tq * D * f32
        attnblk = 2 * bt * tq * SK * f32
        live = (bt * SK * 2 * Dp                               # kv intermediate
                + 3 * bt * tq * SK                             # scores / p / attn
                + 2 * bt * tq * Dp                             # q, ctx
                + 2 * tq * SK) * f32                           # iota / mask
        return weights + xblk + scr + outblk + attnblk + live

    # Batch tile: target ~2k projection rows per step; keep >= 2 steps on the
    # parallel axis when B >= 2 (both v7x TCs busy); shrink to the VMEM budget.
    Bt = max(1, min(B, max(1, 2048 // SK)))
    if B >= 2:
        Bt = min(Bt, (B + 1) // 2)
    while Bt > 1 and footprint(Bt, Tq) > budget:
        Bt -= 1
    while (Tq > 8 and footprint(Bt, Tq) > budget
           and SK % (Tq // 2) == 0 and (Tq // 2) % 8 == 0):
        Tq //= 2

    Bp = _round_up(B, Bt)
    num_b = Bp // Bt
    num_q = SK // Tq

    # Pad only batch and sequence axes; last axis stays at true D (no 8x HBM
    # read inflation for small d_model).
    x_pad = jnp.pad(x3, ((0, Bp - B), (0, SK - S), (0, 0)))

    # Fused QKV weight (D, 3*Dp) / bias (1, 3*Dp) for right-multiply (PyTorch
    # Linear weights are (out, in)).  Each chunk is padded to Dp columns so the
    # in-kernel q/k/v slices are 128-lane aligned; padded columns are zero.
    w_fused = jnp.zeros((D, 3 * Dp), jnp.float32)
    b_fused = jnp.zeros((1, 3 * Dp), jnp.float32)
    for c in range(3):
        w_fused = w_fused.at[:, c * Dp:c * Dp + D].set(
            wqkv[c * D:(c + 1) * D, :].T.astype(jnp.float32))
        b_fused = b_fused.at[0, c * Dp:c * Dp + D].set(
            bqkv[c * D:(c + 1) * D].astype(jnp.float32))
    # o_proj: padded contraction rows are zero -> contribute exactly nothing.
    wo_pad = jnp.zeros((Dp, D), jnp.float32).at[:D, :].set(
        wo.T.astype(jnp.float32))
    bo_pad = bo.astype(jnp.float32).reshape(1, D)

    kernel = functools.partial(_mhsa_kernel, n=n, m_len=m_len, s_real=S, tq=Tq)
    const2d = lambda b, q: (0, 0)

    grid_spec = pltpu.PrefetchScalarGridSpec(
        num_scalar_prefetch=0,
        grid=(num_b, num_q),
        in_specs=[
            pl.BlockSpec((Bt, SK, D), lambda b, q: (b, 0, 0)),   # x (resident per b)
            _const_spec((D, 3 * Dp), const2d),                   # fused qkv weight
            _const_spec((1, 3 * Dp), const2d),                   # fused qkv bias
            _const_spec((Dp, D), const2d),                       # o_proj weight
            _const_spec((1, D), const2d),                        # o_proj bias
        ],
        out_specs=[
            pl.BlockSpec((Bt, Tq, D), lambda b, q: (b, q, 0)),   # output
            pl.BlockSpec((Bt, Tq, SK), lambda b, q: (b, q, 0)),  # attn weights
        ],
        scratch_shapes=[
            pltpu.VMEM((Bt, SK, Dp), jnp.float32),               # K cache
            pltpu.VMEM((Bt, SK, Dp), jnp.float32),               # V cache
        ],
    )

    vmem_limit = int(min(vmem_cap, max(32 * 2**20, int(1.3 * footprint(Bt, Tq)))))

    out_p, attn_p = pl.pallas_call(
        kernel,
        out_shape=[
            jax.ShapeDtypeStruct((Bp, SK, D), jnp.float32),
            jax.ShapeDtypeStruct((Bp, SK, SK), jnp.float32),
        ],
        grid_spec=grid_spec,
        compiler_params=pltpu.CompilerParams(
            dimension_semantics=("parallel", "arbitrary"),
            vmem_limit_bytes=vmem_limit),
    )(x_pad, w_fused, b_fused, wo_pad, bo_pad)

    out = out_p[:B, :S, :]
    attn = attn_p[:B, :S, :S]
    return out, attn[:, None]   # (B, num_heads=1, S, S) as in the PyTorch module


def create_overlap_mask(num_subsequences, n, m_len):
    """Same semantics as MultiHeadSelfAttention1.create_mask (True == masked)."""
    i = jnp.arange(num_subsequences)[:, None]
    j = jnp.arange(num_subsequences)[None, :]
    overlap = (i * n < j * n + m_len) & (j * n < i * n + m_len)
    return overlap | (i == j)


def _reference(x, wqkv, bqkv, wo, bo, n, m_len):
    """Pure-JAX reference mirroring the PyTorch forward (num_heads == 1)."""
    B, _, _, D = x.shape
    x3 = x.reshape(B, -1, D).astype(jnp.float32)
    S = x3.shape[1]
    hp = jax.lax.Precision.HIGHEST
    qkv = jnp.einsum("bsd,ed->bse", x3, wqkv, precision=hp) + bqkv
    q, k, v = qkv[..., :D], qkv[..., D:2 * D], qkv[..., 2 * D:]
    scores = jnp.einsum("bsd,btd->bst", q, k, precision=hp)
    mask = create_overlap_mask(S, n, m_len)
    scores = jnp.where(mask[None], -jnp.inf, scores)
    w = jax.nn.softmax(scores, axis=-1)
    ctx = jnp.einsum("bst,btd->bsd", w, v, precision=hp)
    out = jnp.einsum("bsd,ed->bse", ctx, wo, precision=hp) + bo
    return out, w[:, None]


if __name__ == "__main__":
    # Small shapes consistent with the module: x is NCHW, W == d_model,
    # num_heads must be 1 (head_dim is hard-coded to 1 in the module).
    B, C, H, W = 2, 4, 4, 16          # -> S = C*H = 16, d_model = 16
    d_model = W
    n_stride, m_window = 4, 8         # self.n / self.m used by create_mask

    key = jax.random.PRNGKey(0)
    kx, kw1, kb1, kw2, kb2 = jax.random.split(key, 5)

    x = jax.random.normal(kx, (B, C, H, W), dtype=jnp.float32)

    # Deterministic parameter init (PyTorch Linear layout: weight (out, in)).
    bound = 1.0 / np.sqrt(d_model)
    wqkv = jax.random.uniform(kw1, (3 * d_model, d_model), jnp.float32, -bound, bound)
    bqkv = jax.random.uniform(kb1, (3 * d_model,), jnp.float32, -bound, bound)
    wo = jax.random.uniform(kw2, (d_model, d_model), jnp.float32, -bound, bound)
    bo = jax.random.uniform(kb2, (d_model,), jnp.float32, -bound, bound)

    out, attn = multi_head_self_attention1(
        x, wqkv, bqkv, wo, bo, n=n_stride, m_len=m_window)
    jax.block_until_ready((out, attn))

    ref_out, ref_attn = _reference(x, wqkv, bqkv, wo, bo, n_stride, m_window)
    np.testing.assert_allclose(np.asarray(out), np.asarray(ref_out),
                               rtol=1e-4, atol=1e-4)
    np.testing.assert_allclose(np.asarray(attn), np.asarray(ref_attn),
                               rtol=1e-4, atol=1e-4)

    print("KERNEL_OK")
</pallas_src>

<mosaic_0001>
module attributes {stable_mosaic.version = 11 : i64} {
  func.func @_mhsa_kernel(%arg0: i32, %arg1: i32, %arg2: memref<1x16x16xf32, #tpu.memory_space<vmem>>, %arg3: memref<16x384xf32, #tpu.memory_space<vmem>>, %arg4: memref<1x384xf32, #tpu.memory_space<vmem>>, %arg5: memref<128x16xf32, #tpu.memory_space<vmem>>, %arg6: memref<1x16xf32, #tpu.memory_space<vmem>>, %arg7: memref<1x16x16xf32, #tpu.memory_space<vmem>>, %arg8: memref<1x16x16xf32, #tpu.memory_space<vmem>>, %arg9: memref<1x16x128xf32, #tpu.memory_space<vmem>>, %arg10: memref<1x16x128xf32, #tpu.memory_space<vmem>>) attributes {dimension_semantics = [#tpu.dimension_semantics<parallel>, #tpu.dimension_semantics<arbitrary>], iteration_bounds = array<i64: 2, 1>, scalar_prefetch = 0 : i64, scratch_operands = 2 : i64, tpu.core_type = #tpu.core_type<tc>, window_params = [{transform_indices = @transform_0, window_bounds = array<i64: 1, 16, 16>}, {pipeline_mode = #tpu.pipeline_mode<synchronous>, transform_indices = @transform_1, window_bounds = array<i64: 16, 384>}, {pipeline_mode = #tpu.pipeline_mode<synchronous>, transform_indices = @transform_2, window_bounds = array<i64: 1, 384>}, {pipeline_mode = #tpu.pipeline_mode<synchronous>, transform_indices = @transform_3, window_bounds = array<i64: 128, 16>}, {pipeline_mode = #tpu.pipeline_mode<synchronous>, transform_indices = @transform_4, window_bounds = array<i64: 1, 16>}, {transform_indices = @transform_5, window_bounds = array<i64: 1, 16, 16>}, {transform_indices = @transform_6, window_bounds = array<i64: 1, 16, 16>}]} {
    %c0_i32 = arith.constant 0 : i32
    %0 = arith.cmpi eq, %arg1, %c0_i32 : i32
    %1 = arith.extui %0 : i1 to i32
    %c0_i32_0 = arith.constant 0 : i32
    %2 = arith.cmpi ne, %1, %c0_i32_0 : i32
    scf.if %2 {
      %c0_33 = arith.constant 0 : index
      %c0_34 = arith.constant 0 : index
      %c0_35 = arith.constant 0 : index
      %64 = vector.load %arg2[%c0_33, %c0_34, %c0_35] : memref<1x16x16xf32, #tpu.memory_space<vmem>>, vector<1x16x16xf32>
      %65 = vector.shape_cast %64 : vector<1x16x16xf32> to vector<16x16xf32>
      %c0_36 = arith.constant 0 : index
      %c128 = arith.constant 128 : index
      %66 = vector.load %arg3[%c0_36, %c128] : memref<16x384xf32, #tpu.memory_space<vmem>>, vector<16x256xf32>
      %cst_37 = arith.constant dense<0.000000e+00> : vector<16x256xf32>
      %67 = tpu.matmul %65, %66, %cst_37 {dimension_numbers = #tpu.dot_dimension_numbers<[1], [0], [0], [1], [0, 0, 1, 1], [], []>} : vector<16x16xf32>, vector<16x256xf32>, vector<16x256xf32> -> vector<16x256xf32>
      %c0_38 = arith.constant 0 : index
      %c128_39 = arith.constant 128 : index
      %68 = vector.load %arg4[%c0_38, %c128_39] : memref<1x384xf32, #tpu.memory_space<vmem>>, vector<1x256xf32>
      %69 = vector.broadcast %68 : vector<1x256xf32> to vector<16x256xf32>
      %70 = arith.addf %67, %69 : vector<16x256xf32>
      %71 = vector.extract_strided_slice %70 {offsets = [0, 0], sizes = [16, 128], strides = [1, 1]} : vector<16x256xf32> to vector<16x128xf32>
      %72 = vector.shape_cast %71 : vector<16x128xf32> to vector<1x16x128xf32>
      %c0_40 = arith.constant 0 : index
      %c0_41 = arith.constant 0 : index
      %c0_42 = arith.constant 0 : index
      %73 = vector.load %arg9[%c0_40, %c0_41, %c0_42] : memref<1x16x128xf32, #tpu.memory_space<vmem>>, vector<1x16x128xf32>
      tpu.vector_store %arg9[%c0_40, %c0_41, %c0_42], %72 {strides = array<i32>} : memref<1x16x128xf32, #tpu.memory_space<vmem>>, vector<1x16x128xf32>,
      %74 = vector.extract_strided_slice %70 {offsets = [0, 128], sizes = [16, 128], strides = [1, 1]} : vector<16x256xf32> to vector<16x128xf32>
      %75 = vector.shape_cast %74 : vector<16x128xf32> to vector<1x16x128xf32>
      %c0_43 = arith.constant 0 : index
      %c0_44 = arith.constant 0 : index
      %c0_45 = arith.constant 0 : index
      %76 = vector.load %arg10[%c0_43, %c0_44, %c0_45] : memref<1x16x128xf32, #tpu.memory_space<vmem>>, vector<1x16x128xf32>
      tpu.vector_store %arg10[%c0_43, %c0_44, %c0_45], %75 {strides = array<i32>} : memref<1x16x128xf32, #tpu.memory_space<vmem>>, vector<1x16x128xf32>,
    } else {
    }
    %c16_i32 = arith.constant 16 : i32
    %3 = arith.muli %arg1, %c16_i32 : i32
    %4 = tpu.assume_multiple %3, 16 : i32
    %c0 = arith.constant 0 : index
    %5 = arith.index_cast %4 : i32 to index
    %c0_1 = arith.constant 0 : index
    %6 = vector.load %arg2[%c0, %5, %c0_1] : memref<1x16x16xf32, #tpu.memory_space<vmem>>, vector<1x16x16xf32>
    %7 = vector.shape_cast %6 : vector<1x16x16xf32> to vector<16x16xf32>
    %c0_2 = arith.constant 0 : index
    %c0_3 = arith.constant 0 : index
    %8 = vector.load %arg3[%c0_2, %c0_3] : memref<16x384xf32, #tpu.memory_space<vmem>>, vector<16x128xf32>
    %cst = arith.constant dense<0.000000e+00> : vector<16x128xf32>
    %9 = tpu.matmul %7, %8, %cst {dimension_numbers = #tpu.dot_dimension_numbers<[1], [0], [0], [1], [0, 0, 1, 1], [], []>} : vector<16x16xf32>, vector<16x128xf32>, vector<16x128xf32> -> vector<16x128xf32>
    %c0_4 = arith.constant 0 : index
    %c0_5 = arith.constant 0 : index
    %10 = vector.load %arg4[%c0_4, %c0_5] : memref<1x384xf32, #tpu.memory_space<vmem>>, vector<1x128xf32>
    %11 = vector.broadcast %10 : vector<1x128xf32> to vector<16x128xf32>
    %12 = arith.addf %9, %11 : vector<16x128xf32>
    %13 = vector.shape_cast %12 : vector<16x128xf32> to vector<1x16x128xf32>
    %c0_6 = arith.constant 0 : index
    %c0_7 = arith.constant 0 : index
    %c0_8 = arith.constant 0 : index
    %14 = vector.load %arg9[%c0_6, %c0_7, %c0_8] : memref<1x16x128xf32, #tpu.memory_space<vmem>>, vector<1x16x128xf32>
    "tpu.trace_start"() <{level = 10 : i32, message = "bqd,bkd->bqk"}> : () -> ()
    %cst_9 = arith.constant dense<0.000000e+00> : vector<1x16x16xf32>
    %15 = tpu.matmul %13, %14, %cst_9 {dimension_numbers = #tpu.dot_dimension_numbers<[2], [2], [1], [1], [0, 0, 0, 1, 1, 1], [0], [0]>} : vector<1x16x128xf32>, vector<1x16x128xf32>, vector<1x16x16xf32> -> vector<1x16x16xf32>
    "tpu.trace_stop"() : () -> ()
    %16 = tpu.iota {dimensions = array<i32: 0>} : vector<16x16xi32>
    %17 = vector.broadcast %4 : i32 to vector<16x16xi32>
    %18 = arith.addi %16, %17 : vector<16x16xi32>
    %19 = tpu.iota {dimensions = array<i32: 1>} : vector<16x16xi32>
    %c4_i32 = arith.constant 4 : i32
    %20 = vector.broadcast %c4_i32 : i32 to vector<16x16xi32>
    %21 = arith.muli %18, %20 : vector<16x16xi32>
    %c4_i32_10 = arith.constant 4 : i32
    %22 = vector.broadcast %c4_i32_10 : i32 to vector<16x16xi32>
    %23 = arith.muli %19, %22 : vector<16x16xi32>
    %c8_i32 = arith.constant 8 : i32
    %24 = vector.broadcast %c8_i32 : i32 to vector<16x16xi32>
    %25 = arith.addi %23, %24 : vector<16x16xi32>
    %26 = arith.cmpi slt, %21, %25 : vector<16x16xi32>
    %c4_i32_11 = arith.constant 4 : i32
    %27 = vector.broadcast %c4_i32_11 : i32 to vector<16x16xi32>
    %28 = arith.muli %19, %27 : vector<16x16xi32>
    %c4_i32_12 = arith.constant 4 : i32
    %29 = vector.broadcast %c4_i32_12 : i32 to vector<16x16xi32>
    %30 = arith.muli %18, %29 : vector<16x16xi32>
    %c8_i32_13 = arith.constant 8 : i32
    %31 = vector.broadcast %c8_i32_13 : i32 to vector<16x16xi32>
    %32 = arith.addi %30, %31 : vector<16x16xi32>
    %33 = arith.cmpi slt, %28, %32 : vector<16x16xi32>
    %34 = arith.andi %26, %33 : vector<16x16xi1>
    %35 = arith.cmpi eq, %18, %19 : vector<16x16xi32>
    %36 = arith.ori %34, %35 : vector<16x16xi1>
    %c16_i32_14 = arith.constant 16 : i32
    %37 = vector.broadcast %c16_i32_14 : i32 to vector<16x16xi32>
    %38 = arith.cmpi sge, %19, %37 : vector<16x16xi32>
    %39 = arith.ori %36, %38 : vector<16x16xi1>
    %40 = vector.shape_cast %39 : vector<16x16xi1> to vector<1x16x16xi1>
    %cst_15 = arith.constant -1.000000e+30 : f32
    %41 = vector.broadcast %cst_15 : f32 to vector<1x16x16xf32>
    %42 = arith.select %40, %41, %15 : vector<1x16x16xi1>, vector<1x16x16xf32>
    %cst_16 = arith.constant dense<0xFF800000> : vector<1x16xf32>
    %43 = vector.multi_reduction <maximumf>, %42, %cst_16 [2] : vector<1x16x16xf32> to vector<1x16xf32>
    %44 = vector.shape_cast %43 : vector<1x16xf32> to vector<1x16x1xf32>
    %45 = vector.broadcast %44 : vector<1x16x1xf32> to vector<1x16x16xf32>
    %46 = arith.subf %42, %45 : vector<1x16x16xf32>
    %47 = math.exp %46 : vector<1x16x16xf32>
    %cst_17 = arith.constant dense<0.000000e+00> : vector<1x16xf32>
    %48 = vector.multi_reduction <add>, %47, %cst_17 [2] : vector<1x16x16xf32> to vector<1x16xf32>
    %49 = vector.shape_cast %48 : vector<1x16xf32> to vector<1x16x1xf32>
    %50 = tpu.reciprocal %49 : vector<1x16x1xf32> -> vector<1x16x1xf32>
    %51 = vector.broadcast %50 : vector<1x16x1xf32> to vector<1x16x16xf32>
    %52 = arith.mulf %47, %51 : vector<1x16x16xf32>
    %c0_18 = arith.constant 0 : index
    %c0_19 = arith.constant 0 : index
    %c0_20 = arith.constant 0 : index
    %53 = vector.load %arg8[%c0_18, %c0_19, %c0_20] : memref<1x16x16xf32, #tpu.memory_space<vmem>>, vector<1x16x16xf32>
    tpu.vector_store %arg8[%c0_18, %c0_19, %c0_20], %52 {strides = array<i32>} : memref<1x16x16xf32, #tpu.memory_space<vmem>>, vector<1x16x16xf32>,
    %c0_21 = arith.constant 0 : index
    %c0_22 = arith.constant 0 : index
    %c0_23 = arith.constant 0 : index
    %54 = vector.load %arg10[%c0_21, %c0_22, %c0_23] : memref<1x16x128xf32, #tpu.memory_space<vmem>>, vector<1x16x128xf32>
    "tpu.trace_start"() <{level = 10 : i32, message = "bqk,bkd->bqd"}> : () -> ()
    %cst_24 = arith.constant dense<0.000000e+00> : vector<1x16x128xf32>
    %55 = tpu.matmul %52, %54, %cst_24 {dimension_numbers = #tpu.dot_dimension_numbers<[2], [1], [1], [2], [0, 0, 0, 1, 1, 2], [0], [0]>} : vector<1x16x16xf32>, vector<1x16x128xf32>, vector<1x16x128xf32> -> vector<1x16x128xf32>
    "tpu.trace_stop"() : () -> ()
    %56 = vector.shape_cast %55 : vector<1x16x128xf32> to vector<16x128xf32>
    %c0_25 = arith.constant 0 : index
    %c0_26 = arith.constant 0 : index
    %57 = vector.load %arg5[%c0_25, %c0_26] : memref<128x16xf32, #tpu.memory_space<vmem>>, vector<128x16xf32>
    %cst_27 = arith.constant dense<0.000000e+00> : vector<16x16xf32>
    %58 = tpu.matmul %56, %57, %cst_27 {dimension_numbers = #tpu.dot_dimension_numbers<[1], [0], [0], [1], [0, 0, 1, 1], [], []>} : vector<16x128xf32>, vector<128x16xf32>, vector<16x16xf32> -> vector<16x16xf32>
    %c0_28 = arith.constant 0 : index
    %c0_29 = arith.constant 0 : index
    %59 = vector.load %arg6[%c0_28, %c0_29] : memref<1x16xf32, #tpu.memory_space<vmem>>, vector<1x16xf32>
    %60 = vector.broadcast %59 : vector<1x16xf32> to vector<16x16xf32>
    %61 = arith.addf %58, %60 : vector<16x16xf32>
    %62 = vector.shape_cast %61 : vector<16x16xf32> to vector<1x16x16xf32>
    %c0_30 = arith.constant 0 : index
    %c0_31 = arith.constant 0 : index
    %c0_32 = arith.constant 0 : index
    %63 = vector.load %arg7[%c0_30, %c0_31, %c0_32] : memref<1x16x16xf32, #tpu.memory_space<vmem>>, vector<1x16x16xf32>
    tpu.vector_store %arg7[%c0_30, %c0_31, %c0_32], %62 {strides = array<i32>} : memref<1x16x16xf32, #tpu.memory_space<vmem>>, vector<1x16x16xf32>,
    return
  }
  func.func @transform_0(%arg0: i32, %arg1: i32) -> (i32, i32, i32) {
    %c0_i32 = arith.constant 0 : i32
    %c0_i32_0 = arith.constant 0 : i32
    %c0_i32_1 = arith.constant 0 : i32
    return %arg0, %c0_i32, %c0_i32_0 : i32, i32, i32
  }
  func.func @transform_1(%arg0: i32, %arg1: i32) -> (i32, i32) {
    %c0_i32 = arith.constant 0 : i32
    %c0_i32_0 = arith.constant 0 : i32
    %c0_i32_1 = arith.constant 0 : i32
    return %c0_i32, %c0_i32_0 : i32, i32
  }
  func.func @transform_2(%arg0: i32, %arg1: i32) -> (i32, i32) {
    %c0_i32 = arith.constant 0 : i32
    %c0_i32_0 = arith.constant 0 : i32
    %c0_i32_1 = arith.constant 0 : i32
    return %c0_i32, %c0_i32_0 : i32, i32
  }
  func.func @transform_3(%arg0: i32, %arg1: i32) -> (i32, i32) {
    %c0_i32 = arith.constant 0 : i32
    %c0_i32_0 = arith.constant 0 : i32
    %c0_i32_1 = arith.constant 0 : i32
    return %c0_i32, %c0_i32_0 : i32, i32
  }
  func.func @transform_4(%arg0: i32, %arg1: i32) -> (i32, i32) {
    %c0_i32 = arith.constant 0 : i32
    %c0_i32_0 = arith.constant 0 : i32
    %c0_i32_1 = arith.constant 0 : i32
    return %c0_i32, %c0_i32_0 : i32, i32
  }
  func.func @transform_5(%arg0: i32, %arg1: i32) -> (i32, i32, i32) {
    %c0_i32 = arith.constant 0 : i32
    %c0_i32_0 = arith.constant 0 : i32
    return %arg0, %arg1, %c0_i32 : i32, i32, i32
  }
  func.func @transform_6(%arg0: i32, %arg1: i32) -> (i32, i32, i32) {
    %c0_i32 = arith.constant 0 : i32
    %c0_i32_0 = arith.constant 0 : i32
    return %arg0, %arg1, %c0_i32 : i32, i32, i32
  }
}

</mosaic_0001>

<bundles_post_ra>
// kernel: multi_head_self_attention1.1
= control target key start
LH: loop header
LB: loop body
LE: loop exit
PB: predicated region body
PF: predicated region fallthrough
CT: control target
= control target key end

     0   :  { %12 = vsyncpa [#allocation5], 0  ;;  %s1583_s0 = inlined_call_operand.vmem [shape: f32[2,16,16], index: 0, kind: input, shape index: {}]   ;;  %s1584_s1 = inlined_call_operand.vmem [shape: f32[16,384], index: 1, kind: input, shape index: {}]   ;;  %s1585_s2 = inlined_call_operand.vmem [shape: f32[1,384], index: 2, kind: input, shape index: {}]   ;;  %s1586_s3 = inlined_call_operand.vmem [shape: f32[128,16], index: 3, kind: input, shape index: {}]   ;;  %s1587_s4 = inlined_call_operand.vmem [shape: f32[1,16], index: 4, kind: input, shape index: {}]   ;;  %s1588_s5 = inlined_call_operand.hbm [shape: f32[2,16,16], index: 5, kind: output, shape index: {0}]   ;;  %s1589_s6 = inlined_call_operand.hbm [shape: f32[2,16,16], index: 6, kind: output, shape index: {1}]  }
   0x1   :  { %14 = vsyncpa [#allocation5 + $0x1], 0 }
   0x2   :  { %15 = vsyncpa [#allocation7], 0 }
   0x3   :  { %17 = vsyncpa [#allocation7 + $0x1], 0  ;;  %s1331_s21 = smov 0   ;;  %s1333_s22 = smov 0  }
   0x4   :  { %s1335_s23 = smov 0   ;;  %s1337_s24 = smov 0  }
   0x5   :  { %s1339_s25 = smov 0   ;;  %s1341_s26 = smov 0  }
   0x6 LB: > { %s946_s27 = sadd.s32 4294967295, %s1289_s26   ;;  %s947_s28 = sadd.s32 4294967294, %s1289_s26   ;;  %s1289_s26 = sphi %s1341_s26, %s23_s26   ;;  %s1285_s25 = sphi %s1339_s25, %s1596_s25   ;;  %s1281_s24 = sphi %s1337_s24, %s1595_s24   ;;  %s1277_s23 = sphi %s1335_s23, %s1594_s23   ;;  %s1273_s22 = sphi %s1333_s22, %s1593_s22   ;;  %s1269_s21 = sphi %s1331_s21, %s1592_s21  }
   0x7   : > { %s35_s29 = sadd.s32 1, %s1285_s25  ;;  %s154_s30 = sadd.s32 1, %s1277_s23 }
   0x8   : > { %p37_p0 = scmp.ge.s32.totalorder %s35_s29, 2  ;;  %p164_p1 = scmp.ne.s32.totalorder %s1277_s23, %s1273_s22 }
   0x9   : > { %p165_p2 = scmp.eq.s32.totalorder %s946_s27, 1  ;;  %p170_p3 = scmp.ne.s32.totalorder %s1273_s22, %s1269_s21 }
   0xa   : > { %s1598_s29 = smov (%p37_p0, %s35_s29), 0  ;;  %p171_p5 = scmp.eq.s32.totalorder %s947_s28, 1 }
   0xb   : > { %p1371_p4 = por %p165_p2, %p164_p1  ;;  %s149_s8 = ssub.s32 %s1285_s25, %s1598_s29 }
   0xc   : > { %p950_p6 = scmp.ge.s32.totalorder %s1289_s26, 1  ;;  %p152_p7 = scmp.eq.s32.totalorder %s149_s8, 0 }
   0xd   : > { %p1378_p8 = por %p171_p5, %p170_p3  ;;  %p237_p9 = scmp.lt.s32.totalorder %s1289_s26, 3 }
   0xe   : > { %s1384_s10 = scalar_select %p152_p7, %s1277_s23, %s154_s30  }
   0xf   : > { %p238_p10 = pnand %p950_p6, %p237_p9 }
  0x10   : > { %v286_v0 = vld [vmem:[%s1584_s1 + $0x10] sm:$0xff] (!%p238_p10)  ;;  %v288_v1 = vld [vmem:[%s1584_s1 + $0x28] sm:$0xff] (!%p238_p10)  ;;  %p272_p11 = scmp.lt.s32.totalorder (!%p238_p10), %s1281_s24, 1  ;;  %v287_v4 = vld [vmem:[%s1584_s1 + $0x20] sm:$0xff] (!%p238_p10)  ;;  %v1291_v5 = vmov (!%p238_p10), 0.0   ;;  %vm301_vm0 = vcmask (!%p238_p10), 130048   ;;  %v291_v12 = vlaneseq (!%p238_p10) }
  0x11   : > { %241 = sbr.rel (%p238_p10) target bundleno = 1232 (0x4d0), region = 40  ;;  %v285_v2 = vld [vmem:[%s1584_s1 + $0x8] sm:$0xff] (!%p238_p10)  ;;  %v1060_v3 = vpack.c.bf16 (!%p238_p10), %v288_v1, %v286_v0  ;;  %372 = vmatprep.mubr.f32.mxu0 (!%p238_p10), %v1291_v5  ;;  %v393_v6 = vld [vmem:[%s1584_s1] sm:$0xff] (!%p238_p10)  ;;  %v394_v7 = vld [vmem:[%s1584_s1 + $0x18] sm:$0xff] (!%p238_p10)  ;;  %s1472_s28 = sand.u32 (!%p238_p10), 1, %s1273_s22  }
  0x12   : > { %v1062_v8 = vpack.c.bf16 (!%p238_p10), %v287_v4, %v285_v2  ;;  %v1064_v9 = vpack.c.bf16 (!%p238_p10), %v394_v7, %v393_v6  ;;  %v292_v13 = vshrl.u32 (!%p238_p10), %v291_v12, 7  ;;  %v289_v15 = vld [vmem:[%s1585_s2 + $0x1] sm:$0x3] (!%p238_p10)  ;;  %v957_v28 = vld [vmem:[%s1585_s2] ss:$0 sm:$0xff] (!%p238_p10)  ;;  %v568_v34 = vand.u32 (!%p238_p10), 127, %v291_v12 }
  0x13   : > { %1061 = vmatprep.subr.bf16.mxu0 (!%p238_p10), %v1060_v3  ;;  %v697_v58 = vld [vmem:[%s1586_s3] sm:$0xff] (!%p238_p10)  ;;  %v698_v59 = vld [vmem:[%s1586_s3 + $0x8] sm:$0xff] (!%p238_p10)  ;;  %v699_v60 = vld [vmem:[%s1586_s3 + $0x10] sm:$0xff] (!%p238_p10)  ;;  %s972_s12 = sshll.u32 (!%p238_p10), %s1281_s24, 8  ;;  %s803_s16 = scalar_lea.sflag (!%p238_p10), [#allocation7], %s1472_s28 }
  0x14   : > { %1063 = vmatpush1.bf16.msra.mxu0 (!%p238_p10), %v1062_v8  ;;  %v293_v14 = vsub.s32 (!%p238_p10), 0, %v292_v13  ;;  %v297_v16 = vsub.s32 (!%p238_p10), 1, %v292_v13  ;;  %v563_v35 = vadd.s32 (!%p238_p10), 8, %v292_v13  ;;  %v571_v36 = vmul.u32 (!%p238_p10), 4, %v568_v34  ;;  %v700_v62 = vld [vmem:[%s1586_s3 + $0x18] sm:$0xff] (!%p238_p10)  ;;  %v701_v0 = vld [vmem:[%s1586_s3 + $0x20] sm:$0xff] (!%p238_p10)  ;;  %s1487_s15 = scalar_lea.hbm (!%p238_p10), %s1589_s6, %s972_s12 }
  0x15   : > { %1065 = vmatprep.subr.bf16.mxu0 (!%p238_p10), %v1064_v9  ;;  %v569_v37 = vmul.u32 (!%p238_p10), 4, %v292_v13  ;;  %vm581_vm6 = vcmp.eq.s32.totalorder (!%p238_p10), %v292_v13, %v568_v34  ;;  %vm585_vm9 = vcmp.ge.s32.totalorder (!%p238_p10), %v568_v34, 16  ;;  %v1076_v61 = vpack.c.bf16 (!%p238_p10), %v698_v59, %v697_v58  ;;  %v702_v1 = vld [vmem:[%s1586_s3 + $0x28] sm:$0xff] (!%p238_p10)  ;;  %v703_v3 = vld [vmem:[%s1586_s3 + $0x30] sm:$0xff] (!%p238_p10)  ;;  %v704_v4 = vld [vmem:[%s1586_s3 + $0x38] sm:$0xff] (!%p238_p10)  ;;  %s1292_s18 = smov (!%p238_p10), [#allocation6]  }
  0x16   : > { %v294_v18 = vrot.slane (!%p238_p10), %v289_v15, %v293_v14  ;;  %v298_v20 = vrot.slane (!%p238_p10), %v289_v15, %v297_v16  ;;  %v570_v38 = vmul.u32 (!%p238_p10), 4, %v563_v35  ;;  %v572_v39 = vadd.s32 (!%p238_p10), 8, %v571_v36  ;;  %v705_v6 = vld [vmem:[%s1586_s3 + $0x40] sm:$0xff] (!%p238_p10)  ;;  %v706_v7 = vld [vmem:[%s1586_s3 + $0x48] sm:$0xff] (!%p238_p10)  ;;  %v711_v15 = vld [vmem:[%s1586_s3 + $0x70] sm:$0xff] (!%p238_p10)  ;;  %s1183_s19 = sshll.u32 (!%p238_p10), %s1292_s18, 4  ;;  %s1184_s19 = int_to_ptr.vmem [resolvable:$false] %s1183_s19 }
  0x17   : > { %v575_v40 = vadd.s32 (!%p238_p10), 8, %v569_v37  ;;  %vm582_vm8 = vcmp.eq.s32.totalorder (!%p238_p10), %v563_v35, %v568_v34  ;;  %v1080_v63 = vpack.c.bf16 (!%p238_p10), %v700_v62, %v699_v60  ;;  %1077 = vmatprep.subr.bf16.mxu1 (!%p238_p10), %v1076_v61  ;;  %v1084_v2 = vpack.c.bf16 (!%p238_p10), %v702_v1, %v701_v0  ;;  %v709_v12 = vld [vmem:[%s1586_s3 + $0x60] sm:$0xff] (!%p238_p10)  ;;  %v710_v13 = vld [vmem:[%s1586_s3 + $0x68] sm:$0xff] (!%p238_p10)  ;;  %v712_v16 = vld [vmem:[%s1586_s3 + $0x78] sm:$0xff] (!%p238_p10)  ;;  %s1185_s20 = scalar_lea.vmem (!%p238_p10), %s1184_s19, 512 }
  0x18   : > { %s273_s30 = scalar_select %p272_p11, %s1281_s24, 1  ;;  %v576_v41 = vadd.s32 8, %v570_v38  ;;  %vm573_vm1 = vcmp.lt.s32.totalorder %v569_v37, %v572_v39  ;;  %vm574_vm3 = vcmp.lt.s32.totalorder %v570_v38, %v572_v39  ;;  %1079 = vmatpush3.bf16.msra.mxu1 %v1076_v61  ;;  %v1092_v8 = vpack.c.bf16 %v706_v7, %v705_v6 }
  0x19   : > { %vm577_vm2 = vcmp.lt.s32.totalorder %v571_v36, %v575_v40  ;;  %1081 = vmatprep.subr.bf16.mxu1 %v1080_v63  ;;  %v1100_v14 = vpack.c.bf16 %v710_v13, %v709_v12 }
  0x1a   : > { %s971_s8 = sshll.u32 %s273_s30, 4  ;;  %vm578_vm4 = vcmp.lt.s32.totalorder %v571_v36, %v576_v41  ;;  %vm579_vm5 = vmand %vm573_vm1, %vm577_vm2  ;;  %s951_s30 = sshll.u32 %s1472_s28, 4 }
  0x1b   : > { %s276_s13 = scalar_lea.vmem %s1583_s0, %s971_s8  ;;  %vm580_vm7 = vmand %vm574_vm3, %vm578_vm4  ;;  %s271_s8 = scalar_lea.vmem [#allocation6], %s951_s30 }
  0x1c   : > { %v283_v10 = vld [vmem:[%s276_s13] sm:$0xff]  ;;  %v284_v11 = vld [vmem:[%s276_s13 + $0x8] sm:$0xff]  ;;  %vm583_vm10 = vmor %vm579_vm5, %vm581_vm6  ;;  %1083 = vmatpush3.bf16.msra.mxu1 %v1080_v63  ;;  %s836_s11 = sshll.u32 %s271_s8, 4  ;;  %s1489_s11 = int_to_ptr.vmem [resolvable:$true] %s836_s11 }
  0x1d   : > { %955 = vmatmul.mubr.msk.f32.vlgmr.msra.gmra.mrb[0].mxu0 %vm301_vm0, %v283_v10  ;;  %vm584_vm11 = vmor %vm580_vm7, %vm582_vm8  ;;  %1085 = vmatprep.subr.bf16.mxu1 %v1084_v2  ;;  %s1179_s17 = scalar_lea.vmem %s1489_s11, 256  ;;  %p1186_p1 = scmp.lt.s32.totalorder %s1489_s11, %s1184_s19 }
  0x1e   : > { %378 = vmatprep.mubr.f32.mxu0 %v1291_v5  ;;  %1067 = vmatpush3.bf16.msra.mxu0 %v1064_v9  ;;  %vm586_vm12 = vmor %vm583_vm10, %vm585_vm9  ;;  %v1088_v5 = vpack.c.bf16 %v704_v4, %v703_v3  ;;  %v707_v9 = vld [vmem:[%s1586_s3 + $0x50] sm:$0xff]  ;;  %p1180_p12 = scmp.ne.s32.totalorder %s1489_s11, %s1179_s17  ;;  %p1187_p2 = scmp.lt.s32.totalorder %s1185_s20, %s1179_s17 }
  0x1f   : > { %vm587_vm13 = vmor %vm584_vm11, %vm585_vm9 }
  0x20   : > { %1087 = vmatpush3.bf16.msra.mxu1 %v1084_v2  ;;  %p1181_p13 = pnand %p1180_p12, %p1371_p4  ;;  %p1188_p3 = por %p1187_p2, %p1186_p1 }
  0x21   : > { %956 = vmatmul.mubr.msk.f32.gmra.mrb[2].mxu0 %vm301_vm0, %v284_v11  ;;  %1089 = vmatprep.subr.bf16.mxu1 %v1088_v5 }
  0x22   : > { %1008 = vmatprep.mubr.msk.f32.mxu0 %vm301_vm0, %v283_v10  ;;  %v708_v10 = vld [vmem:[%s1586_s3 + $0x58] sm:$0xff]  ;;  %p1182_p0 = pneg %p1181_p13 }
  0x24   : > { %1091 = vmatpush3.bf16.msra.mxu1 %v1088_v5  ;;  %p1189_p5 = pnand %p1188_p3, %p1182_p0 }
  0x25   : > { %1009 = vmatmul.mubr.msk.f32.vlgmr.msra.gmra.mrb[4].mxu0 %vm301_vm0, %v284_v11  ;;  %1093 = vmatprep.subr.bf16.mxu1 %v1092_v8  ;;  %v1096_v11 = vpack.c.bf16 %v708_v10, %v707_v9 }
  0x28   : > { %1095 = vmatpush3.bf16.msra.mxu1 %v1092_v8 }
  0x29   : > { %1097 = vmatprep.subr.bf16.mxu1 %v1096_v11 }
  0x2c   : > { %1099 = vmatpush3.bf16.msra.mxu1 %v1096_v11 }
  0x2d   : > { %1101 = vmatprep.subr.bf16.mxu1 %v1100_v14 }
  0x30   : > { %1103 = vmatpush3.bf16.msra.mxu1 %v1100_v14 }
  0xf0   : > { %v374_v17 = vpop.f32.mrb[0].mxu0 }
  0xf1   : > { %v376_v19 = vpop.f32.mrb[1].mxu0  ;;  %v375_v22 = vadd.f32 %v374_v17, %v294_v18  ;;  %v1104_v17 = vpack.c.bf16 %v712_v16, %v711_v15 }
  0xf2   : > { %v377_v25 = vadd.f32 %v376_v19, %v298_v20 }
  0xf3   : > { %1105 = vmatprep.subr.bf16.mxu1 %v1104_v17 }
  0xf4   : > { %v380_v21 = vpop.f32.mrb[2].mxu0  ;;  %1107 = vmatpush3.bf16.msra.mxu1 %v1104_v17 }
  0xf5   : > { %v381_v23 = vadd.f32 %v380_v21, %v294_v18  ;;  %v382_v24 = vpop.f32.mrb[3].mxu0 }
  0xf6   : > { %v383_v26 = vadd.f32 %v382_v24, %v298_v20 }
  0xf7   : > { %v1068_v27 = vpack.c.bf16 %v381_v23, %v375_v22 }
  0xf8   : > { %v1072_v29 = vpack.c.bf16 %v383_v26, %v377_v25  ;;  %v1010_v30 = vpop.f32.mrb[4].mxu0 }
  0xf9   : > { %1069 = vmatprep.subr.bf16.mxu0 %v1068_v27  ;;  %v475_v31 = vpop.f32.mrb[5].mxu0  ;;  %v481_v33 = vadd.f32 %v1010_v30, %v957_v28 }
  0xfa   : > { %1071 = vmatpush3.bf16.xpose.msra.mxu0 %v1068_v27  ;;  %v476_v32 = vadd.f32 %v957_v28, %v475_v31 }
  0xfb   : > { %1073 = vmatprep.subr.bf16.mxu0 %v1072_v29 }
  0xfc   : > { %1015 = vmatprep.mubr.f32.mxu0 %v476_v32 }
 0x101   : > { %1016 = vmatmul.mubr.f32.vlgmr.msra.gmra.mrb[6].mxu0 %v481_v33 }
 0x102   : > { %1075 = vmatpush3.bf16.msra.mxu0 %v1072_v29 }
 0x1d4   : > { %v1017_v42 = vpop.f32.mrb[6].mxu0 }
 0x1d5   : > { %v552_v43 = vpop.f32.mrb[7].mxu0  ;;  %v589_v46 = vsel %vm587_vm13, -1e+30, %v1017_v42 }
 0x1d6   : > { %v588_v44 = vsel %vm586_vm12, -1e+30, %v552_v43  ;;  %v593_v47 = vsel %vm301_vm0, %v589_v46, -inf }
 0x1d7   : > { %v590_v45 = vsel %vm301_vm0, %v588_v44, -inf }
 0x1d8   : > { %591 = vmax.xlane.f32.xlu0 %v590_v45 }
 0x1dc   : > { %594 = vmax.xlane.f32.xlu0 %v593_v47 }
 0x265   : > { %v592_v48 = vpop.xlane.xlu0 %591 }
 0x266   : > { %v596_v49 = vsub.f32 %v588_v44, %v592_v48 }
 0x268   : > { %v598_v50 = vmul.f32 1.442695, %v596_v49 }
 0x269   : > { %v595_v51 = vpop.xlane.xlu0 %594 }
 0x26a   : > { %1171 = vpow2.f32 %v598_v50  ;;  %v597_v52 = vsub.f32 %v589_v46, %v595_v51 }
 0x26c   : > { %v600_v53 = vmul.f32 1.442695, %v597_v52 }
 0x26e   : > { %1173 = vpow2.f32 %v600_v53 }
 0x274   : > { %v1172_v54 = vpop.eup %1171 }
 0x275   : > { %v602_v55 = vsel %vm301_vm0, %v1172_v54, 0.0 }
 0x276   : > { %603 = vadd.xlane.f32.xlu1 %v602_v55 }
 0x278   : > { %v1174_v56 = vpop.eup %1173 }
 0x279   : > { %v605_v57 = vsel %vm301_vm0, %v1174_v56, 0.0 }
 0x27a   : > { %606 = vadd.xlane.f32.xlu1 %v605_v57 }
 0x303   : > { %v604_v18 = vpop.xlane.xlu1 %603 }
 0x304   : > { %1175 = vrcp.f32 %v604_v18 }
 0x307   : > { %v607_v19 = vpop.xlane.xlu1 %606 }
 0x308   : > { %1177 = vrcp.f32 %v607_v19 }
 0x30e   : > { %v1176_v20 = vpop.eup %1175 }
 0x30f   : > { %v610_v21 = vmul.f32 %v1176_v20, %v1172_v54 }
 0x311   : > { %1022 = vmatprep.mubr.msk.f32.mxu0 %vm301_vm0, %v610_v21  ;;  %612 = vst.msk [vmem:[%s271_s8] sm:$0xff] %vm301_vm0, %v610_v21 }
 0x312   : > { %v1178_v22 = vpop.eup %1177 }
 0x313   : > { %v611_v23 = vmul.f32 %v1178_v22, %v1174_v56 }
 0x315   : > { %1023 = vmatmul.mubr.msk.f32.vlgmr.msra.gmra.mrb[8].mxu0 %vm301_vm0, %v611_v23  ;;  %613 = vst.msk [vmem:[%s271_s8 + $0x8] sm:$0xff] %vm301_vm0, %v611_v23 }
 0x3e8   : > { %v1024_v24 = vpop.f32.mrb[8].mxu0 }
 0x3e9   : > { %v688_v25 = vpop.f32.mrb[9].mxu0 }
 0x3ea   : > { %1057 = vmatprep.mubr.f32.mxu1 %v688_v25 }
 0x3eb   : > { %1058 = vmatmul.mubr.f32.vlgmr.msra.gmra.mrb[0].mxu1 %v1024_v24 }
 0x3ec   : > { %1192 = shalt.err (!%p1189_p5)
}
 0x3ed   : > { %s1193_s27 = scalar_lea.hbm %s1487_s15, 256  ;;  %s1197_s14 = scalar_lea.hbm %s1589_s6, 512 }
 0x3ee   : > { %p1194_p6 = scmp.ne.s32.totalorder %s1487_s15, %s1193_s27  ;;  %p1198_p10 = scmp.lt.u32.totalorder %s1487_s15, %s1589_s6 }
 0x3ef   : > { %p1199_p11 = scmp.lt.u32.totalorder %s1197_s14, %s1193_s27  ;;  %p1201_p13 = scmp.lt.u32.totalorder %s1193_s27, %s1487_s15 }
 0x3f0   : > { %p1195_p7 = pnand %p1194_p6, %p1371_p4 }
 0x3f1   : > { %p1200_p12 = por %p1199_p11, %p1198_p10 }
 0x3f2   : > { %p1196_p9 = pneg %p1195_p7 }
 0x3f3   : > { %p1202_p0 = por %p1201_p13, %p1200_p12 }
 0x3f5   : > { %p1203_p1 = pnand %p1202_p0, %p1196_p9 }
 0x3f7   : > { %1206 = shalt.err (!%p1203_p1)
}
 0x3f8   : > { %s1293_s17 = smov 128   ;;  %s1294_s20 = smov 8   ;;  %v962_v26 = vld [vmem:[%s1587_s4] ss:$0 sm:$0xff] }
 0x3f9   : > { %1109 = dma.vmem_to_hbm [thread:$0]  (%p1371_p4), %s1489_s11, 256, %s1487_s15, %s803_s16, %s1293_s17, %s1293_s17, %s1294_s20  }
 0x3fa   : > { %s264_s13 = scalar_lea.vmem [#allocation4], %s951_s30  ;;  %s1530_s11 = scalar_lea.hbm %s1588_s5, %s972_s12 }
 0x3fb   : > { %s818_s14 = sshll.u32 %s264_s13, 4  ;;  %s798_s30 = scalar_lea.sflag [#allocation5], %s1472_s28  ;;  %s1523_s14 = int_to_ptr.vmem [resolvable:$true] %s818_s14 }
 0x3fc   : > { %s1207_s15 = scalar_lea.vmem %s1523_s14, 256  ;;  %s1295_s16 = smov [#allocation4]  }
 0x3fd   : > { %p1208_p2 = scmp.ne.s32.totalorder %s1523_s14, %s1207_s15  ;;  %s1211_s27 = sshll.u32 %s1295_s16, 4  ;;  %s1212_s27 = int_to_ptr.vmem [resolvable:$false] %s1211_s27 }
 0x3fe   : > { %s1213_s8 = scalar_lea.vmem %s1212_s27, 512  ;;  %p1214_p6 = scmp.lt.s32.totalorder %s1523_s14, %s1212_s27 }
 0x3ff   : > { %p1209_p3 = pnand %p1208_p2, %p1371_p4  ;;  %p1215_p7 = scmp.lt.s32.totalorder %s1213_s8, %s1207_s15 }
 0x401   : > { %p1210_p5 = pneg %p1209_p3  ;;  %p1216_p9 = por %p1215_p7, %p1214_p6 }
 0x403   : > { %p1217_p10 = pnand %p1216_p9, %p1210_p5 }
 0x4be   : > { %v1059_v27 = vpop.f32.mrb[0].mxu1 }
 0x4bf   : > { %v792_v28 = vadd.f32 %v1059_v27, %v962_v26  ;;  %v786_v29 = vpop.f32.mrb[1].mxu1 }
 0x4c0   : > { %v787_v30 = vadd.f32 %v962_v26, %v786_v29 }
 0x4c1   : > { %796 = vst.msk [vmem:[%s264_s13 + $0x8] sm:$0xff] %vm301_vm0, %v792_v28 }
 0x4c2   : > { %795 = vst.msk [vmem:[%s264_s13] sm:$0xff] %vm301_vm0, %v787_v30 }
 0x4c3   : > { %1220 = shalt.err (!%p1217_p10)
}
 0x4c4   : > { %s1221_s24 = scalar_lea.hbm %s1530_s11, 256  ;;  %s1225_s18 = scalar_lea.hbm %s1588_s5, 512 }
 0x4c5   : > { %p1222_p11 = scmp.ne.s32.totalorder %s1530_s11, %s1221_s24  ;;  %p1226_p0 = scmp.lt.u32.totalorder %s1530_s11, %s1588_s5 }
 0x4c6   : > { %p1227_p1 = scmp.lt.u32.totalorder %s1225_s18, %s1221_s24  ;;  %p1229_p3 = scmp.lt.u32.totalorder %s1221_s24, %s1530_s11 }
 0x4c7   : > { %p1223_p12 = pnand %p1222_p11, %p1371_p4 }
 0x4c8   : > { %p1228_p2 = por %p1227_p1, %p1226_p0 }
 0x4c9   : > { %p1224_p13 = pneg %p1223_p12 }
 0x4ca   : > { %p1230_p5 = por %p1229_p3, %p1228_p2 }
 0x4cc   : > { %p1231_p6 = pnand %p1230_p5, %p1224_p13 }
 0x4ce   : > { %1234 = shalt.err (!%p1231_p6)
}
 0x4cf   : > { %1108 = dma.vmem_to_hbm [thread:$0]  (%p1371_p4), %s1523_s14, 256, %s1530_s11, %s798_s30, %s1293_s17, %s1293_s17, %s1294_s20  }
 0x4d0 PF: > { %p1119_p7 = scmp.ge.s32.totalorder %s1289_s26, 2  ;;  %s851_s15 = sand.u32 1, %s1269_s21  }
 0x4d1   : > { %s852_s27 = scalar_lea.sflag [#allocation5], %s851_s15 }
 0x4d2   : > { %p1113_p9 = pnand %p1119_p7, %p1378_p8 }
 0x4d4   : > { %1260 = dma.done.wait (!%p1113_p9), %s852_s27, 256  }
 0x4d5   : > { %1262 = vsyncadd (!%p1113_p9), %s852_s27, 4294967040  ;;  %s861_s7 = scalar_lea.sflag [#allocation7], %s851_s15 }
 0x4d6   : > { %1264 = dma.done.wait (!%p1113_p9), %s861_s7, 256  }
 0x4d7   : > { %1266 = vsyncadd (!%p1113_p9), %s861_s7, 4294967040  ;;  %s23_s26 = sadd.s32 1, %s1289_s26   ;;  %s1592_s21 = smov %s1273_s22 }
 0x4d8   : > { %p20_p10 = scmp.ge.s32.totalorder %s23_s26, 4   ;;  %s1593_s22 = smov %s1277_s23 }
 0x4d9   : > { %s1594_s23 = smov %s1384_s10  ;;  %s1595_s24 = smov %s1285_s25 }
 0x4da   : > { %s1596_s25 = smov %s1598_s29  ;;  %22 = sbr.rel (!%p20_p10) target bundleno = 6 (0x6), region = 97 }
 0x4e1   :  { %866 = vsyncpa [#allocation5], 1 }
 0x4e2   :  { %868 = vsyncpa [#allocation5 + $0x1], 1 }
 0x4e3   :  { %869 = vsyncpa [#allocation7], 1 }
 0x4e4   :  { %871 = vsyncpa [#allocation7 + $0x1], 1 }

</bundles_post_ra>
